<compile_context>
chip_gen: v5e
topology: v5e:2x2
jax: 0.10.0
libtpu: 0.0.40
codegen_flags: <defaults>
</compile_context>

<pallas_src>
import jax
import jax.numpy as jnp
from jax.experimental import pallas as pl
from jax.experimental.pallas import tpu as pltpu


def _identity_kernel(x_ref, o_ref):
    # Hot path: straight copy of the current VMEM tile.
    o_ref[...] = x_ref[...]


def _budgets():
    """(tile_bytes, vmem_limit_bytes) per chip generation.

    v5e/v6e have 128 MiB physical VMEM -> bigger tiles amortize per-step
    overhead.  v7x (and unknown chips) stay at 4 MiB tiles / 32 MiB scoped
    limit (64 MiB physical VMEM on v7x)."""
    kind = ""
    try:
        kind = jax.devices()[0].device_kind.lower()
    except Exception:
        pass
    if ("v5" in kind) or ("v6" in kind):
        return 8 << 20, 64 << 20
    return 4 << 20, 32 << 20


def _sublane_step(itemsize: int) -> int:
    # Sub-32-bit dtypes pack along sublanes: 8 rows f32, 16 bf16/f16, 32 int8.
    return max(8, 32 // max(1, itemsize))


def _choose_cols(total: int, sub: int):
    """Lane-dense column width (multiple of 128) dividing `total`; prefer one
    that also leaves a sublane-aligned row count."""
    for cols in (4096, 2048, 1024, 512, 256, 128):
        if total % cols == 0 and (total // cols) % sub == 0:
            return cols
    for cols in (4096, 2048, 1024, 512, 256, 128):
        if total % cols == 0:
            return cols
    return None


def _choose_row_tile(rows: int, cols: int, itemsize: int, tile_bytes: int) -> int:
    """Row tile within the byte budget, multiple of the dtype's sublane step,
    preferring exact divisors of `rows` (no ragged edge tiles).  Keeps >=2
    tiles along the parallel axis when possible so both v7x TensorCores can
    issue DMAs concurrently."""
    sub = _sublane_step(itemsize)
    max_rows = max(sub, (tile_bytes // (cols * itemsize)) // sub * sub)
    if rows >= 2 * sub:
        max_rows = min(max_rows, max(sub, ((rows // 2) // sub) * sub))
    if rows <= max_rows:
        return rows
    for cand in range(max_rows, 0, -sub):
        if rows % cand == 0:
            return cand
    return max_rows  # ragged last tile handled by the cdiv grid (edge only)


def _copy_2d(x2: jax.Array, tile_bytes: int, vmem_limit: int) -> jax.Array:
    """Tiled lane-dense Pallas copy of a 2D [rows, cols] slab.  `cols` is
    either a multiple of 128 or the full last-dim extent."""
    rows, cols = x2.shape
    itemsize = jnp.dtype(x2.dtype).itemsize
    tr = _choose_row_tile(rows, cols, itemsize, tile_bytes)
    grid = (pl.cdiv(rows, tr),)

    return pl.pallas_call(
        _identity_kernel,
        out_shape=jax.ShapeDtypeStruct((rows, cols), x2.dtype),
        grid_spec=pltpu.PrefetchScalarGridSpec(
            num_scalar_prefetch=0,
            grid=grid,
            in_specs=[pl.BlockSpec((tr, cols), lambda i: (i, 0))],
            out_specs=pl.BlockSpec((tr, cols), lambda i: (i, 0)),
        ),
        cost_estimate=pl.CostEstimate(
            flops=0,
            transcendentals=0,
            bytes_accessed=2 * rows * cols * itemsize,
        ),
        compiler_params=pltpu.CompilerParams(
            dimension_semantics=("parallel",),
            vmem_limit_bytes=vmem_limit,
        ),
    )(x2)


def identity_pallas(x: jax.Array, *, force_materialize: bool = False) -> jax.Array:
    """Identity forward pass (y = x).

    nn.Identity is a pure pass-through, so by default this returns `x`
    unchanged: no pallas_call, no HBM read/write.  Set
    `force_materialize=True` to produce a fresh output buffer via a
    lane-dense tiled Pallas copy (e.g. when buffer decoupling is required)."""
    if not force_materialize:
        return x

    orig_shape = x.shape
    total = x.size
    if total == 0:
        return x

    tile_bytes, vmem_limit = _budgets()
    itemsize = jnp.dtype(x.dtype).itemsize
    sub = _sublane_step(itemsize)
    flat = x.reshape(total)  # row-major flatten: order-preserving round trip

    cols = _choose_cols(total, sub)
    if cols is not None:
        out = _copy_2d(flat.reshape(-1, cols), tile_bytes, vmem_limit)
        return out.reshape(orig_shape)

    # total % 128 != 0.  No pad/slice round-trips: if the whole array fits in
    # one tile, copy it as a single full-extent block (Mosaic masks the tail
    # lanes); otherwise copy the 128-aligned bulk through the kernel and
    # stitch the <128-element tail outside.
    if total * itemsize <= tile_bytes:
        out = _copy_2d(flat.reshape(1, total), tile_bytes, vmem_limit)
        return out.reshape(orig_shape)

    bulk = (total // 128) * 128
    out_bulk = _copy_2d(flat[:bulk].reshape(-1, 128), tile_bytes, vmem_limit)
    return jnp.concatenate(
        [out_bulk.reshape(bulk), flat[bulk:]], axis=0
    ).reshape(orig_shape)


if __name__ == "__main__":
    key = jax.random.PRNGKey(0)
    # NCHW, consistent with PyTorch conv-style inputs fed through SimCLR.
    x = jax.random.normal(key, (2, 4, 16, 16), dtype=jnp.float32)

    # Default path: true identity, no kernel launch.
    y = identity_pallas(x)
    jax.block_until_ready(y)
    assert y.shape == x.shape and y.dtype == x.dtype
    assert bool(jnp.array_equal(y, x))

    # Materialized path: exercises the lane-dense Pallas copy kernel.
    y_mat = identity_pallas(x, force_materialize=True)
    jax.block_until_ready(y_mat)
    assert y_mat.shape == x.shape and y_mat.dtype == x.dtype
    assert bool(jnp.array_equal(y_mat, x))

    # Larger input: exercises the multi-tile (>=2 row tiles) parallel grid.
    kb = jax.random.PRNGKey(1)
    big = jax.random.normal(kb, (64, 4096), dtype=jnp.float32)
    y_big = identity_pallas(big, force_materialize=True)
    jax.block_until_ready(y_big)
    assert bool(jnp.array_equal(y_big, big))

    # Odd-sized 1D input: exercises the non-multiple-of-128 full-block path.
    z = jax.random.normal(key, (1000,), dtype=jnp.float32)
    yz = identity_pallas(z, force_materialize=True)
    jax.block_until_ready(yz)
    assert bool(jnp.array_equal(yz, z))

    print("KERNEL_OK")
</pallas_src>

<mosaic_0001>
module attributes {stable_mosaic.version = 11 : i64} {
  func.func @_identity_kernel(%arg0: i32, %arg1: memref<8x256xf32, #tpu.memory_space<vmem>>, %arg2: memref<8x256xf32, #tpu.memory_space<vmem>>) attributes {dimension_semantics = [#tpu.dimension_semantics<parallel>], iteration_bounds = array<i64: 1>, scalar_prefetch = 0 : i64, scratch_operands = 0 : i64, tpu.core_type = #tpu.core_type<tc>, window_params = [{transform_indices = @transform_0, window_bounds = array<i64: 8, 256>}, {transform_indices = @transform_1, window_bounds = array<i64: 8, 256>}]} {
    %c0 = arith.constant 0 : index
    %c0_0 = arith.constant 0 : index
    %0 = vector.load %arg1[%c0, %c0_0] : memref<8x256xf32, #tpu.memory_space<vmem>>, vector<8x256xf32>
    %c0_1 = arith.constant 0 : index
    %c0_2 = arith.constant 0 : index
    %1 = vector.load %arg2[%c0_1, %c0_2] : memref<8x256xf32, #tpu.memory_space<vmem>>, vector<8x256xf32>
    tpu.vector_store %arg2[%c0_1, %c0_2], %0 {strides = array<i32>} : memref<8x256xf32, #tpu.memory_space<vmem>>, vector<8x256xf32>,
    return
  }
  func.func @transform_0(%arg0: i32) -> (i32, i32) {
    %c0_i32 = arith.constant 0 : i32
    %c0_i32_0 = arith.constant 0 : i32
    return %arg0, %c0_i32 : i32, i32
  }
  func.func @transform_1(%arg0: i32) -> (i32, i32) {
    %c0_i32 = arith.constant 0 : i32
    %c0_i32_0 = arith.constant 0 : i32
    return %arg0, %c0_i32 : i32, i32
  }
}

</mosaic_0001>

<bundles_post_ra>
// kernel: tpu_custom_call.1
= control target key start
LH: loop header
LB: loop body
LE: loop exit
PB: predicated region body
PF: predicated region fallthrough
CT: control target
= control target key end

     0   :  { %6 = vsyncpa [#allocation3], 0  ;;  %s116_s0 = inlined_call_operand.hbm [shape: f32[8,256], index: 0, kind: input, shape index: {}]   ;;  %s117_s1 = inlined_call_operand.hbm [shape: f32[8,256], index: 1, kind: output, shape index: {}]  }
   0x1   :  { %7 = vsyncpa [#allocation4], 0  ;;  %s13_s8 = sshll.u32 %s116_s0, 4  ;;  %s98_s9 = smov [#allocation2]   ;;  %s14_s8 = int_to_ptr.hbm [resolvable:$true] %s13_s8 }
   0x2   :  { %s15_s10 = sshll.u32 %s98_s9, 4  ;;  %s16_s10 = int_to_ptr.vmem [resolvable:$true] %s15_s10 }
   0x3   :  { %18 = dma.hbm_to_vmem [thread:$0]  %s14_s8, 256, %s16_s10, [#allocation3]  }
   0x4   :  { %94 = dma.done.wait [#allocation3], 256  }
   0x5   :  { %95 = vsyncadd [#allocation3], 4294967040  ;;  %s99_s11 = smov [#allocation5]   ;;  %s34_s15 = sshll.u32 %s117_s1, 4  ;;  %v23_v0 = vld [vmem:[#allocation2] sm:$0xff]  ;;  %v24_v1 = vld [vmem:[#allocation2 + $0x8] sm:$0xff]  ;;  %s35_s15 = int_to_ptr.hbm [resolvable:$true] %s34_s15 }
   0x6   :  { %s32_s12 = sshll.u32 %s99_s11, 4  ;;  %25 = vst [vmem:[#allocation5] sm:$0xff] %v23_v0  ;;  %s33_s12 = int_to_ptr.vmem [resolvable:$true] %s32_s12 }
   0x7   :  { %26 = vst [vmem:[#allocation5 + $0x8] sm:$0xff] %v24_v1 }
   0x8   :  { %37 = dma.vmem_to_hbm [thread:$0]  %s33_s12, 256, %s35_s15, [#allocation4]  }
   0x9   :  { %96 = dma.done.wait [#allocation4], 256  }
   0xa   :  { %97 = vsyncadd [#allocation4], 4294967040 }
   0xb   :  { %42 = vsyncpa [#allocation3], 1 }
   0xc   :  { %43 = vsyncpa [#allocation4], 1 }

</bundles_post_ra>
